<compile_context>
chip_gen: v6e
topology: v6e:2x2x1
jax: 0.10.0
libtpu: 0.0.40
codegen_flags: <defaults>
</compile_context>

<pallas_src>
import jax
import jax.numpy as jnp
from jax import lax
from jax.experimental import pallas as pl
from jax.experimental.pallas import tpu as pltpu

WINDOW_SIZE = 11
SIGMA = 1.5
C1 = 0.01 ** 2
C2 = 0.03 ** 2


def gaussian_1d(window_size: int, sigma: float = SIGMA) -> jnp.ndarray:
    x = jnp.arange(window_size, dtype=jnp.float32)
    g = jnp.exp(-((x - window_size // 2) ** 2) / (2.0 * sigma ** 2))
    return g / jnp.sum(g)


def band_matrix(n: int, g: jnp.ndarray, pad: int) -> jnp.ndarray:
    """M[i, i'] = g[i' - i + pad] if 0 <= i'-i+pad < K else 0 (zero padding)."""
    k = g.shape[0]
    idx = jnp.arange(n)
    diff = idx[None, :] - idx[:, None] + pad
    valid = (diff >= 0) & (diff < k)
    return jnp.where(valid, g[jnp.clip(diff, 0, k - 1)], 0.0).astype(jnp.float32)


def _make_ssim_kernel(p: int, nc_valid: int, needs_mask: bool):
    """Kernel over one block of `p` flattened planes.

    Refs: o_ref (p, HW), t_ref (p, HW), kron_ref (HW, HW),
          out_ref (1, 8, 128) partial-sum tile, conv_ref VMEM (5p, HW) scratch.
    """
    n_chunks = p // 8

    def kernel(o_ref, t_ref, kron_ref, out_ref, conv_ref):
        # Native-dtype DMA; math in f32 (sigma terms are conv(x*x) - mu^2
        # cancellations and must stay in f32).
        o = o_ref[...].astype(jnp.float32)          # (p, HW)
        t = t_ref[...].astype(jnp.float32)          # (p, HW)

        # Build the stacked operand in-register (no scratch round-trip) and run
        # all six grouped Gaussian "same" convolutions as ONE MXU matmul:
        # row-major-flattened 2D conv == x_flat @ (RH^T kron RW).
        stack = jnp.concatenate([t, o, t * t, o * o, t * o], axis=0)   # (5p, HW)
        # NOTE: default f32 matmul precision matched the reference within 1e-4;
        # pass precision=lax.Precision.HIGHEST here if tighter accuracy is
        # needed at larger H*W.
        conv_ref[...] = jnp.dot(stack, kron_ref[...],
                                preferred_element_type=jnp.float32)    # (5p, HW)

        block_row0 = pl.program_id(0) * p

        # Chunked (fully unrolled) elementwise epilogue: 8-row sublane slices
        # keep the live vreg set small even at P ~ 48-56, HW ~ 1024.
        total = jnp.float32(0.0)
        for c in range(n_chunks):
            r = c * 8
            mu1 = conv_ref[0 * p + r:0 * p + r + 8, :]
            mu2 = conv_ref[1 * p + r:1 * p + r + 8, :]
            e_tt = conv_ref[2 * p + r:2 * p + r + 8, :]
            e_oo = conv_ref[3 * p + r:3 * p + r + 8, :]
            e_to = conv_ref[4 * p + r:4 * p + r + 8, :]

            mu1_sq = mu1 * mu1
            mu2_sq = mu2 * mu2
            mu1_mu2 = mu1 * mu2
            sigma1_sq = e_tt - mu1_sq
            sigma2_sq = e_oo - mu2_sq
            sigma12 = e_to - mu1_mu2

            num = (2.0 * mu1_mu2 + C1) * (2.0 * sigma12 + C2)
            den = (mu1_sq + mu2_sq + C1) * (sigma1_sq + sigma2_sq + C2)
            # EUP approximate reciprocal + one Newton step: keeps the divide
            # off the VALU path at ~f32 accuracy.
            inv = pl.reciprocal(den, approx=True)
            inv = inv * (2.0 - den * inv)
            ssim = num * inv

            if needs_mask:
                # Rows past nc_valid belong to the (unspecified) boundary-block
                # padding and must not contribute to the sum.
                row = (block_row0 + r
                       + lax.broadcasted_iota(jnp.int32, (8, 1), 0))
                ssim = jnp.where(row < nc_valid, ssim, 0.0)

            total = total + jnp.sum(ssim)

        # Lane/sublane-dense partial-sum tile (one per independent grid step);
        # the wrapper reads element [b, 0, 0] of each block and reduces.
        out_ref[...] = jnp.broadcast_to(total, (1, 8, 128)).astype(jnp.float32)

    return kernel


def _mxu_geometry():
    """Best-effort (MXU M-target for the fused matmul, TensorCores per chip)."""
    try:
        kind = jax.devices()[0].device_kind.lower()
    except Exception:
        return 256, 1
    m_target = 256 if ("v6" in kind or "v7" in kind) else 128
    n_cores = 2 if "v7" in kind else 1
    return m_target, n_cores


def ssim_loss(output: jnp.ndarray, target: jnp.ndarray,
              window_size: int = WINDOW_SIZE, size_average: bool = True):
    """SSIM (size_average=True path) — matches SSIMLoss.forward."""
    assert output.shape == target.shape
    if not size_average:
        # TODO(synk): size_average=False (per-sample means) needs per-plane
        # partial outputs; the module default (True) is implemented here.
        raise NotImplementedError("size_average=False not implemented")

    n, c, h, w = output.shape
    nc, hw = n * c, h * w
    pad = window_size // 2

    if hw > 1024:
        # TODO(synk): large images need a halo-tiled / separable (RW then RH^T)
        # conv instead of the dense (H*W, H*W) Kronecker operator.
        raise NotImplementedError("H*W > 1024 not supported by this kernel")

    # Fused conv operator: vec_row(RH @ X @ RW) = x_row @ kron(RH^T, RW).
    g = gaussian_1d(window_size)
    rh = band_matrix(h, g, pad)                      # (H, H)
    rw = band_matrix(w, g, pad)                      # (W, W)
    kron = jnp.kron(rh.T, rw)                        # (HW, HW) f32

    # Flatten planes; keep the native dtype (cast happens inside the kernel).
    out_p = output.reshape(nc, hw)
    tgt_p = target.reshape(nc, hw)

    # --- P selection -------------------------------------------------------
    # sub = minimum sublane tile for the input dtype (8 f32 / 16 bf16 / 32 i8).
    itemsize = jnp.dtype(output.dtype).itemsize
    sub = max(8, 32 // max(1, itemsize))
    nc_pad = -(-nc // sub) * sub
    m_target, n_cores = _mxu_geometry()
    p_target = max(sub, ((m_target // 5) // sub) * sub)   # 5P ~ MXU M tile
    if n_cores >= 2:
        # Keep >= 2 grid blocks so both v7x TensorCores get work.
        half = ((nc_pad // 2) // sub) * sub
        p = min(p_target, half) if half >= sub else min(p_target, nc_pad)
    else:
        p = min(p_target, nc_pad)
    p = max(sub, p)

    num_blocks = -(-nc // p)                 # ragged last block allowed
    needs_mask = num_blocks * p != nc        # mask boundary-block padding rows

    plane_spec = pl.BlockSpec((p, hw), lambda b: (b, 0))
    out_spec = pl.BlockSpec((1, 8, 128), lambda b: (b, 0, 0))
    out_shape = jax.ShapeDtypeStruct((num_blocks, 8, 128), jnp.float32)
    kernel = _make_ssim_kernel(p, nc, needs_mask)

    def build(kron_single_buffered: bool):
        if kron_single_buffered:
            # Constant index map -> DMA'd once; single buffer saves HW*HW*4 B.
            kron_spec = pl.BlockSpec((hw, hw), lambda b: (0, 0),
                                     pipeline_mode=pl.Buffered(1))
        else:
            kron_spec = pl.BlockSpec((hw, hw), lambda b: (0, 0))
        kron_bufs = 1 if kron_single_buffered else 2

        est = (2 * 2 * p * hw * itemsize     # double-buffered input blocks
               + kron_bufs * hw * hw * 4     # resident Kronecker operator
               + 5 * p * hw * 4              # stacked matmul LHS
               + 5 * p * hw * 4              # conv-output scratch
               + 2 * 8 * 128 * 4             # output tiles
               + 512 * 1024)                 # epilogue / compiler slack
        # Fits v5e (16 MiB) / v6e (32 MiB) scoped defaults at all supported
        # sizes; allow up to 48 MiB head-room (v7x has 64 MiB physical).
        vmem_limit = int(min(48 * 1024 * 1024,
                             max(est * 5 // 4, 16 * 1024 * 1024)))

        return pl.pallas_call(
            kernel,
            out_shape=out_shape,
            grid_spec=pltpu.PrefetchScalarGridSpec(
                num_scalar_prefetch=0,
                grid=(num_blocks,),
                in_specs=[plane_spec, plane_spec, kron_spec],
                out_specs=out_spec,
                scratch_shapes=[pltpu.VMEM((5 * p, hw), jnp.float32)],
            ),
            compiler_params=pltpu.CompilerParams(
                dimension_semantics=("parallel",),
                vmem_limit_bytes=vmem_limit,
            ),
        )

    try:
        partials = build(True)(out_p, tgt_p, kron)
    except Exception:
        # Fallback if this jax build rejects single-buffered pipeline_mode.
        partials = build(False)(out_p, tgt_p, kron)

    total = jnp.sum(partials[:, 0, 0])
    return total / (n * c * h * w)


def _ssim_reference(output, target, window_size=WINDOW_SIZE):
    """Pure-JAX reference using grouped conv (mirrors F.conv2d semantics)."""
    n, c, h, w = output.shape
    g = gaussian_1d(window_size)
    w2d = jnp.outer(g, g)[None, None, :, :]                    # (1,1,K,K)
    win = jnp.broadcast_to(w2d, (c, 1, window_size, window_size))
    pad = window_size // 2

    def conv(x):
        return lax.conv_general_dilated(
            x, win, window_strides=(1, 1), padding=[(pad, pad), (pad, pad)],
            dimension_numbers=("NCHW", "OIHW", "NCHW"), feature_group_count=c)

    mu1 = conv(target)
    mu2 = conv(output)
    mu1_sq, mu2_sq, mu1_mu2 = mu1 ** 2, mu2 ** 2, mu1 * mu2
    s1 = conv(target * target) - mu1_sq
    s2 = conv(output * output) - mu2_sq
    s12 = conv(target * output) - mu1_mu2
    ssim_map = ((2 * mu1_mu2 + C1) * (2 * s12 + C2)) / (
        (mu1_sq + mu2_sq + C1) * (s1 + s2 + C2))
    return jnp.mean(ssim_map)


if __name__ == "__main__":
    key = jax.random.PRNGKey(0)
    k1, k2, k3, k4 = jax.random.split(key, 4)

    # Primary shape implied by the module usage: N=2, C=4, 16x16 images.
    out1 = jax.random.uniform(k1, (2, 4, 16, 16), dtype=jnp.float32)
    tgt1 = jax.random.uniform(k2, (2, 4, 16, 16), dtype=jnp.float32)
    loss1 = jax.block_until_ready(ssim_loss(out1, tgt1))
    ref1 = jax.block_until_ready(_ssim_reference(out1, tgt1))
    assert jnp.allclose(loss1, ref1, atol=1e-4, rtol=1e-4), (loss1, ref1)

    # Second shape exercises the multi-block grid, the ragged (masked) last
    # block with no wrapper-side padding copy, and the chunked epilogue.
    out2 = jax.random.uniform(k3, (5, 13, 16, 16), dtype=jnp.float32)
    tgt2 = jax.random.uniform(k4, (5, 13, 16, 16), dtype=jnp.float32)
    loss2 = jax.block_until_ready(ssim_loss(out2, tgt2))
    ref2 = jax.block_until_ready(_ssim_reference(out2, tgt2))
    assert jnp.allclose(loss2, ref2, atol=1e-4, rtol=1e-4), (loss2, ref2)

    print("KERNEL_OK")
</pallas_src>

<mosaic_0001>
module attributes {stable_mosaic.version = 11 : i64} {
  func.func @kernel(%arg0: i32, %arg1: memref<8x256xf32, #tpu.memory_space<vmem>>, %arg2: memref<8x256xf32, #tpu.memory_space<vmem>>, %arg3: memref<256x256xf32, #tpu.memory_space<vmem>>, %arg4: memref<1x8x128xf32, #tpu.memory_space<vmem>>, %arg5: memref<40x256xf32, #tpu.memory_space<vmem>>) attributes {dimension_semantics = [#tpu.dimension_semantics<parallel>], iteration_bounds = array<i64: 1>, scalar_prefetch = 0 : i64, scratch_operands = 1 : i64, tpu.core_type = #tpu.core_type<tc>, window_params = [{transform_indices = @transform_0, window_bounds = array<i64: 8, 256>}, {transform_indices = @transform_1, window_bounds = array<i64: 8, 256>}, {pipeline_mode = #tpu.pipeline_mode<synchronous>, transform_indices = @transform_2, window_bounds = array<i64: 256, 256>}, {transform_indices = @transform_3, window_bounds = array<i64: 1, 8, 128>}]} {
    %c0 = arith.constant 0 : index
    %c0_0 = arith.constant 0 : index
    %0 = vector.load %arg1[%c0, %c0_0] : memref<8x256xf32, #tpu.memory_space<vmem>>, vector<8x256xf32>
    %c0_1 = arith.constant 0 : index
    %c0_2 = arith.constant 0 : index
    %1 = vector.load %arg2[%c0_1, %c0_2] : memref<8x256xf32, #tpu.memory_space<vmem>>, vector<8x256xf32>
    %2 = arith.mulf %1, %1 : vector<8x256xf32>
    %3 = arith.mulf %0, %0 : vector<8x256xf32>
    %4 = arith.mulf %1, %0 : vector<8x256xf32>
    %5 = tpu.concatenate %1, %0, %2, %3, %4 in 0 : vector<8x256xf32>, vector<8x256xf32>, vector<8x256xf32>, vector<8x256xf32>, vector<8x256xf32> -> vector<40x256xf32>
    %c0_3 = arith.constant 0 : index
    %c0_4 = arith.constant 0 : index
    %6 = vector.load %arg3[%c0_3, %c0_4] : memref<256x256xf32, #tpu.memory_space<vmem>>, vector<256x256xf32>
    %cst = arith.constant dense<0.000000e+00> : vector<40x256xf32>
    %7 = tpu.matmul %5, %6, %cst {dimension_numbers = #tpu.dot_dimension_numbers<[1], [0], [0], [1], [0, 0, 1, 1], [], []>} : vector<40x256xf32>, vector<256x256xf32>, vector<40x256xf32> -> vector<40x256xf32>
    %c0_5 = arith.constant 0 : index
    %c0_6 = arith.constant 0 : index
    %8 = vector.load %arg5[%c0_5, %c0_6] : memref<40x256xf32, #tpu.memory_space<vmem>>, vector<40x256xf32>
    tpu.vector_store %arg5[%c0_5, %c0_6], %7 {strides = array<i32>} : memref<40x256xf32, #tpu.memory_space<vmem>>, vector<40x256xf32>,
    %c0_7 = arith.constant 0 : index
    %c0_8 = arith.constant 0 : index
    %9 = vector.load %arg5[%c0_7, %c0_8] : memref<40x256xf32, #tpu.memory_space<vmem>>, vector<8x256xf32>
    %c8 = arith.constant 8 : index
    %c0_9 = arith.constant 0 : index
    %10 = vector.load %arg5[%c8, %c0_9] : memref<40x256xf32, #tpu.memory_space<vmem>>, vector<8x256xf32>
    %c16 = arith.constant 16 : index
    %c0_10 = arith.constant 0 : index
    %11 = vector.load %arg5[%c16, %c0_10] : memref<40x256xf32, #tpu.memory_space<vmem>>, vector<8x256xf32>
    %c24 = arith.constant 24 : index
    %c0_11 = arith.constant 0 : index
    %12 = vector.load %arg5[%c24, %c0_11] : memref<40x256xf32, #tpu.memory_space<vmem>>, vector<8x256xf32>
    %c32 = arith.constant 32 : index
    %c0_12 = arith.constant 0 : index
    %13 = vector.load %arg5[%c32, %c0_12] : memref<40x256xf32, #tpu.memory_space<vmem>>, vector<8x256xf32>
    %14 = arith.mulf %9, %9 : vector<8x256xf32>
    %15 = arith.mulf %10, %10 : vector<8x256xf32>
    %16 = arith.mulf %9, %10 : vector<8x256xf32>
    %17 = arith.subf %11, %14 : vector<8x256xf32>
    %18 = arith.subf %12, %15 : vector<8x256xf32>
    %19 = arith.subf %13, %16 : vector<8x256xf32>
    %cst_13 = arith.constant 2.000000e+00 : f32
    %20 = vector.broadcast %cst_13 : f32 to vector<8x256xf32>
    %21 = arith.mulf %20, %16 : vector<8x256xf32>
    %cst_14 = arith.constant 9.99999974E-5 : f32
    %22 = vector.broadcast %cst_14 : f32 to vector<8x256xf32>
    %23 = arith.addf %21, %22 : vector<8x256xf32>
    %cst_15 = arith.constant 2.000000e+00 : f32
    %24 = vector.broadcast %cst_15 : f32 to vector<8x256xf32>
    %25 = arith.mulf %24, %19 : vector<8x256xf32>
    %cst_16 = arith.constant 8.99999984E-4 : f32
    %26 = vector.broadcast %cst_16 : f32 to vector<8x256xf32>
    %27 = arith.addf %25, %26 : vector<8x256xf32>
    %28 = arith.mulf %23, %27 : vector<8x256xf32>
    %29 = arith.addf %14, %15 : vector<8x256xf32>
    %cst_17 = arith.constant 9.99999974E-5 : f32
    %30 = vector.broadcast %cst_17 : f32 to vector<8x256xf32>
    %31 = arith.addf %29, %30 : vector<8x256xf32>
    %32 = arith.addf %17, %18 : vector<8x256xf32>
    %cst_18 = arith.constant 8.99999984E-4 : f32
    %33 = vector.broadcast %cst_18 : f32 to vector<8x256xf32>
    %34 = arith.addf %32, %33 : vector<8x256xf32>
    %35 = arith.mulf %31, %34 : vector<8x256xf32>
    %36 = tpu.reciprocal %35 {approx = true} : vector<8x256xf32> -> vector<8x256xf32>
    %37 = arith.mulf %35, %36 : vector<8x256xf32>
    %cst_19 = arith.constant 2.000000e+00 : f32
    %38 = vector.broadcast %cst_19 : f32 to vector<8x256xf32>
    %39 = arith.subf %38, %37 : vector<8x256xf32>
    %40 = arith.mulf %36, %39 : vector<8x256xf32>
    %41 = arith.mulf %28, %40 : vector<8x256xf32>
    %42 = vector.shape_cast %41 : vector<8x256xf32> to vector<1x8x256xf32>
    %cst_20 = arith.constant dense<0.000000e+00> : vector<1xf32>
    %43 = vector.multi_reduction <add>, %42, %cst_20 [1, 2] : vector<1x8x256xf32> to vector<1xf32>
    %44 = vector.shape_cast %43 : vector<1xf32> to vector<1x1x1xf32>
    %45 = vector.extract %44[0, 0, 0] : f32 from vector<1x1x1xf32>
    %cst_21 = arith.constant 0.000000e+00 : f32
    %46 = arith.addf %cst_21, %45 : f32
    %47 = vector.broadcast %46 : f32 to vector<1x8x128xf32>
    %c0_22 = arith.constant 0 : index
    %c0_23 = arith.constant 0 : index
    %c0_24 = arith.constant 0 : index
    %48 = vector.load %arg4[%c0_22, %c0_23, %c0_24] : memref<1x8x128xf32, #tpu.memory_space<vmem>>, vector<1x8x128xf32>
    tpu.vector_store %arg4[%c0_22, %c0_23, %c0_24], %47 {strides = array<i32>} : memref<1x8x128xf32, #tpu.memory_space<vmem>>, vector<1x8x128xf32>,
    return
  }
  func.func @transform_0(%arg0: i32) -> (i32, i32) {
    %c0_i32 = arith.constant 0 : i32
    %c0_i32_0 = arith.constant 0 : i32
    return %arg0, %c0_i32 : i32, i32
  }
  func.func @transform_1(%arg0: i32) -> (i32, i32) {
    %c0_i32 = arith.constant 0 : i32
    %c0_i32_0 = arith.constant 0 : i32
    return %arg0, %c0_i32 : i32, i32
  }
  func.func @transform_2(%arg0: i32) -> (i32, i32) {
    %c0_i32 = arith.constant 0 : i32
    %c0_i32_0 = arith.constant 0 : i32
    %c0_i32_1 = arith.constant 0 : i32
    return %c0_i32, %c0_i32_0 : i32, i32
  }
  func.func @transform_3(%arg0: i32) -> (i32, i32, i32) {
    %c0_i32 = arith.constant 0 : i32
    %c0_i32_0 = arith.constant 0 : i32
    %c0_i32_1 = arith.constant 0 : i32
    return %arg0, %c0_i32, %c0_i32_0 : i32, i32, i32
  }
}

module attributes {stable_mosaic.version = 11 : i64} {
  func.func @kernel(%arg0: i32, %arg1: memref<8x256xf32, #tpu.memory_space<vmem>>, %arg2: memref<8x256xf32, #tpu.memory_space<vmem>>, %arg3: memref<256x256xf32, #tpu.memory_space<vmem>>, %arg4: memref<1x8x128xf32, #tpu.memory_space<vmem>>, %arg5: memref<40x256xf32, #tpu.memory_space<vmem>>) attributes {dimension_semantics = [#tpu.dimension_semantics<parallel>], iteration_bounds = array<i64: 1>, scalar_prefetch = 0 : i64, scratch_operands = 1 : i64, tpu.core_type = #tpu.core_type<tc>, window_params = [{transform_indices = @transform_0, window_bounds = array<i64: 8, 256>}, {transform_indices = @transform_1, window_bounds = array<i64: 8, 256>}, {pipeline_mode = #tpu.pipeline_mode<synchronous>, transform_indices = @transform_2, window_bounds = array<i64: 256, 256>}, {transform_indices = @transform_3, window_bounds = array<i64: 1, 8, 128>}]} {
    %c0 = arith.constant 0 : index
    %c0_0 = arith.constant 0 : index
    %0 = vector.load %arg1[%c0, %c0_0] : memref<8x256xf32, #tpu.memory_space<vmem>>, vector<8x256xf32>
    %c0_1 = arith.constant 0 : index
    %c0_2 = arith.constant 0 : index
    %1 = vector.load %arg2[%c0_1, %c0_2] : memref<8x256xf32, #tpu.memory_space<vmem>>, vector<8x256xf32>
    %2 = arith.mulf %1, %1 : vector<8x256xf32>
    %3 = arith.mulf %0, %0 : vector<8x256xf32>
    %4 = arith.mulf %1, %0 : vector<8x256xf32>
    %5 = tpu.concatenate %1, %0, %2, %3, %4 in 0 : vector<8x256xf32>, vector<8x256xf32>, vector<8x256xf32>, vector<8x256xf32>, vector<8x256xf32> -> vector<40x256xf32>
    %c0_3 = arith.constant 0 : index
    %c0_4 = arith.constant 0 : index
    %6 = vector.load %arg3[%c0_3, %c0_4] : memref<256x256xf32, #tpu.memory_space<vmem>>, vector<256x256xf32>
    %cst = arith.constant dense<0.000000e+00> : vector<40x256xf32>
    %7 = tpu.matmul %5, %6, %cst {dimension_numbers = #tpu.dot_dimension_numbers<[1], [0], [0], [1], [0, 0, 1, 1], [], []>} : vector<40x256xf32>, vector<256x256xf32>, vector<40x256xf32> -> vector<40x256xf32>
    %c0_5 = arith.constant 0 : index
    %c0_6 = arith.constant 0 : index
    %8 = vector.load %arg5[%c0_5, %c0_6] : memref<40x256xf32, #tpu.memory_space<vmem>>, vector<40x256xf32>
    tpu.vector_store %arg5[%c0_5, %c0_6], %7 {strides = array<i32>} : memref<40x256xf32, #tpu.memory_space<vmem>>, vector<40x256xf32>,
    %c0_7 = arith.constant 0 : index
    %c0_8 = arith.constant 0 : index
    %9 = vector.load %arg5[%c0_7, %c0_8] : memref<40x256xf32, #tpu.memory_space<vmem>>, vector<8x256xf32>
    %c8 = arith.constant 8 : index
    %c0_9 = arith.constant 0 : index
    %10 = vector.load %arg5[%c8, %c0_9] : memref<40x256xf32, #tpu.memory_space<vmem>>, vector<8x256xf32>
    %c16 = arith.constant 16 : index
    %c0_10 = arith.constant 0 : index
    %11 = vector.load %arg5[%c16, %c0_10] : memref<40x256xf32, #tpu.memory_space<vmem>>, vector<8x256xf32>
    %c24 = arith.constant 24 : index
    %c0_11 = arith.constant 0 : index
    %12 = vector.load %arg5[%c24, %c0_11] : memref<40x256xf32, #tpu.memory_space<vmem>>, vector<8x256xf32>
    %c32 = arith.constant 32 : index
    %c0_12 = arith.constant 0 : index
    %13 = vector.load %arg5[%c32, %c0_12] : memref<40x256xf32, #tpu.memory_space<vmem>>, vector<8x256xf32>
    %14 = arith.mulf %9, %9 : vector<8x256xf32>
    %15 = arith.mulf %10, %10 : vector<8x256xf32>
    %16 = arith.mulf %9, %10 : vector<8x256xf32>
    %17 = arith.subf %11, %14 : vector<8x256xf32>
    %18 = arith.subf %12, %15 : vector<8x256xf32>
    %19 = arith.subf %13, %16 : vector<8x256xf32>
    %cst_13 = arith.constant 2.000000e+00 : f32
    %20 = vector.broadcast %cst_13 : f32 to vector<8x256xf32>
    %21 = arith.mulf %20, %16 : vector<8x256xf32>
    %cst_14 = arith.constant 9.99999974E-5 : f32
    %22 = vector.broadcast %cst_14 : f32 to vector<8x256xf32>
    %23 = arith.addf %21, %22 : vector<8x256xf32>
    %cst_15 = arith.constant 2.000000e+00 : f32
    %24 = vector.broadcast %cst_15 : f32 to vector<8x256xf32>
    %25 = arith.mulf %24, %19 : vector<8x256xf32>
    %cst_16 = arith.constant 8.99999984E-4 : f32
    %26 = vector.broadcast %cst_16 : f32 to vector<8x256xf32>
    %27 = arith.addf %25, %26 : vector<8x256xf32>
    %28 = arith.mulf %23, %27 : vector<8x256xf32>
    %29 = arith.addf %14, %15 : vector<8x256xf32>
    %cst_17 = arith.constant 9.99999974E-5 : f32
    %30 = vector.broadcast %cst_17 : f32 to vector<8x256xf32>
    %31 = arith.addf %29, %30 : vector<8x256xf32>
    %32 = arith.addf %17, %18 : vector<8x256xf32>
    %cst_18 = arith.constant 8.99999984E-4 : f32
    %33 = vector.broadcast %cst_18 : f32 to vector<8x256xf32>
    %34 = arith.addf %32, %33 : vector<8x256xf32>
    %35 = arith.mulf %31, %34 : vector<8x256xf32>
    %36 = tpu.reciprocal %35 {approx = true} : vector<8x256xf32> -> vector<8x256xf32>
    %37 = arith.mulf %35, %36 : vector<8x256xf32>
    %cst_19 = arith.constant 2.000000e+00 : f32
    %38 = vector.broadcast %cst_19 : f32 to vector<8x256xf32>
    %39 = arith.subf %38, %37 : vector<8x256xf32>
    %40 = arith.mulf %36, %39 : vector<8x256xf32>
    %41 = arith.mulf %28, %40 : vector<8x256xf32>
    %42 = vector.shape_cast %41 : vector<8x256xf32> to vector<1x8x256xf32>
    %cst_20 = arith.constant dense<0.000000e+00> : vector<1xf32>
    %43 = vector.multi_reduction <add>, %42, %cst_20 [1, 2] : vector<1x8x256xf32> to vector<1xf32>
    %44 = vector.shape_cast %43 : vector<1xf32> to vector<1x1x1xf32>
    %45 = vector.extract %44[0, 0, 0] : f32 from vector<1x1x1xf32>
    %cst_21 = arith.constant 0.000000e+00 : f32
    %46 = arith.addf %cst_21, %45 : f32
    %47 = vector.broadcast %46 : f32 to vector<1x8x128xf32>
    %c0_22 = arith.constant 0 : index
    %c0_23 = arith.constant 0 : index
    %c0_24 = arith.constant 0 : index
    %48 = vector.load %arg4[%c0_22, %c0_23, %c0_24] : memref<1x8x128xf32, #tpu.memory_space<vmem>>, vector<1x8x128xf32>
    tpu.vector_store %arg4[%c0_22, %c0_23, %c0_24], %47 {strides = array<i32>} : memref<1x8x128xf32, #tpu.memory_space<vmem>>, vector<1x8x128xf32>,
    return
  }
  func.func @transform_0(%arg0: i32) -> (i32, i32) {
    %c0_i32 = arith.constant 0 : i32
    %c0_i32_0 = arith.constant 0 : i32
    return %arg0, %c0_i32 : i32, i32
  }
  func.func @transform_1(%arg0: i32) -> (i32, i32) {
    %c0_i32 = arith.constant 0 : i32
    %c0_i32_0 = arith.constant 0 : i32
    return %arg0, %c0_i32 : i32, i32
  }
  func.func @transform_2(%arg0: i32) -> (i32, i32) {
    %c0_i32 = arith.constant 0 : i32
    %c0_i32_0 = arith.constant 0 : i32
    %c0_i32_1 = arith.constant 0 : i32
    return %c0_i32, %c0_i32_0 : i32, i32
  }
  func.func @transform_3(%arg0: i32) -> (i32, i32, i32) {
    %c0_i32 = arith.constant 0 : i32
    %c0_i32_0 = arith.constant 0 : i32
    %c0_i32_1 = arith.constant 0 : i32
    return %arg0, %c0_i32, %c0_i32_0 : i32, i32, i32
  }
}

</mosaic_0001>

<bundles_post_ra>
// kernel: tpu_custom_call.1
= control target key start
LH: loop header
LB: loop body
LE: loop exit
PB: predicated region body
PF: predicated region fallthrough
CT: control target
= control target key end

     0   :  { %8 = vsyncpa [#allocation4], 0  ;;  %s512_s0 = inlined_call_operand.hbm [shape: f32[8,256], index: 0, kind: input, shape index: {}]   ;;  %s513_s1 = inlined_call_operand.hbm [shape: f32[8,256], index: 1, kind: input, shape index: {}]   ;;  %s514_s2 = inlined_call_operand.hbm [shape: f32[256,256], index: 2, kind: input, shape index: {}]   ;;  %s515_s3 = inlined_call_operand.hbm [shape: f32[1,8,128], index: 3, kind: output, shape index: {}]  }
   0x1   :  { %9 = vsyncpa [#allocation7], 0 }
   0x2   :  { %10 = vsyncpa [#allocation5], 0  ;;  %s474_s12 = smov [#allocation6]   ;;  %s475_s14 = smov [#allocation3]  }
   0x3   :  { %s27_s13 = sshll.u32 %s474_s12, 4  ;;  %s17_s15 = sshll.u32 %s475_s14, 4  ;;  %s28_s13 = int_to_ptr.vmem [resolvable:$true] %s27_s13  ;;  %s18_s15 = int_to_ptr.vmem [resolvable:$true] %s17_s15 }
   0x4   :  { %s396_s16 = scalar_lea.vmem %s28_s13, 256  ;;  %p401_p1 = scmp.lt.s32.totalorder %s28_s13, %s28_s13 }
   0x5   :  { %p397_p0 = scmp.ne.s32.totalorder %s28_s13, %s396_s16  ;;  %p402_p2 = scmp.lt.s32.totalorder %s396_s16, %s396_s16 }
   0x7   :  { %p403_p3 = por %p402_p2, %p401_p1 }
   0x9   :  { %p404_p4 = pnand %p403_p3, %p397_p0 }
   0xb   :  { %407 = shalt.err (!%p404_p4)
}
   0xc   :  { %30 = dma.hbm_to_vmem [thread:$0]  %s513_s1, 256, %s28_s13, [#allocation7]  }
   0xd   :  { %s416_s19 = scalar_lea.vmem %s18_s15, 256  ;;  %p421_p6 = scmp.lt.s32.totalorder %s18_s15, %s18_s15 }
   0xe   :  { %p417_p5 = scmp.ne.s32.totalorder %s18_s15, %s416_s19  ;;  %p422_p7 = scmp.lt.s32.totalorder %s416_s19, %s416_s19 }
  0x10   :  { %p423_p8 = por %p422_p7, %p421_p6 }
  0x12   :  { %p424_p9 = pnand %p423_p8, %p417_p5 }
  0x14   :  { %427 = shalt.err (!%p424_p9)
}
  0x15   :  { %20 = dma.hbm_to_vmem [thread:$0]  %s512_s0, 256, %s18_s15, [#allocation4]  }
  0x16   :  { %s476_s22 = smov [#allocation8]  }
  0x17   :  { %s36_s23 = sshll.u32 %s476_s22, 4  ;;  %s37_s23 = int_to_ptr.vmem [resolvable:$true] %s36_s23 }
  0x18   :  { %s436_s24 = scalar_lea.vmem %s37_s23, 8192  ;;  %p441_p11 = scmp.lt.s32.totalorder %s37_s23, %s37_s23 }
  0x19   :  { %p437_p10 = scmp.ne.s32.totalorder %s37_s23, %s436_s24  ;;  %p442_p12 = scmp.lt.s32.totalorder %s436_s24, %s436_s24 }
  0x1b   :  { %p443_p13 = por %p442_p12, %p441_p11 }
  0x1d   :  { %p444_p0 = pnand %p443_p13, %p437_p10 }
  0x1f   :  { %447 = shalt.err (!%p444_p0)
}
  0x20   :  { %s477_s1 = smov 256   ;;  %s478_s25 = smov 16  }
  0x21   :  { %42 = dma.hbm_to_vmem [thread:$0]  %s514_s2, 8192, %s37_s23, [#allocation7], %s477_s1, %s477_s1, %s478_s25  }
  0x22   :  { %468 = dma.done.wait [#allocation4], 256  }
  0x23   :  { %469 = vsyncadd [#allocation4], 4294967040 }
  0x24   :  { %470 = dma.done.wait [#allocation7], 8448  }
  0x25   :  { %471 = vsyncadd [#allocation7], 4294958848  ;;  %v93_v0 = vld [vmem:[#allocation8 + $0xf8] sm:$0xff]  ;;  %v92_v1 = vld [vmem:[#allocation8 + $0xf0] sm:$0xff]  ;;  %s479_s0 = smov [#allocation9]  }
  0x26   :  { %v91_v2 = vld [vmem:[#allocation8 + $0xe8] sm:$0xff]  ;;  %126 = vmatprep.subr.mxu0 %v93_v0  ;;  %312 = vmatprep.subr.mxu1 %v93_v0  ;;  %v90_v3 = vld [vmem:[#allocation8 + $0xe0] sm:$0xff]  ;;  %v89_v4 = vld [vmem:[#allocation8 + $0xd8] sm:$0xff]  ;;  %s302_s2 = sshll.u32 %s479_s0, 4  ;;  %s303_s2 = int_to_ptr.vmem [resolvable:$true] %s302_s2 }
  0x27   :  { %127 = vmatpush1.msra.mxu0 %v92_v1  ;;  %344 = vmatpush1.msra.mxu1 %v92_v1  ;;  %v88_v5 = vld [vmem:[#allocation8 + $0xd0] sm:$0xff]  ;;  %v87_v6 = vld [vmem:[#allocation8 + $0xc8] sm:$0xff]  ;;  %v86_v7 = vld [vmem:[#allocation8 + $0xc0] sm:$0xff]  ;;  %s448_s29 = scalar_lea.vmem %s303_s2, 128  ;;  %p453_p2 = scmp.lt.s32.totalorder %s303_s2, %s303_s2 }
  0x28   :  { %128 = vmatprep.subr.mxu0 %v91_v2  ;;  %313 = vmatprep.subr.mxu1 %v91_v2  ;;  %v85_v8 = vld [vmem:[#allocation8 + $0xb8] sm:$0xff]  ;;  %v84_v9 = vld [vmem:[#allocation8 + $0xb0] sm:$0xff]  ;;  %v83_v10 = vld [vmem:[#allocation8 + $0xa8] sm:$0xff]  ;;  %p449_p1 = scmp.ne.s32.totalorder %s303_s2, %s448_s29  ;;  %p454_p3 = scmp.lt.s32.totalorder %s448_s29, %s448_s29 }
  0x29   :  { %129 = vmatpush1.msra.mxu0 %v90_v3  ;;  %345 = vmatpush1.msra.mxu1 %v90_v3  ;;  %v82_v11 = vld [vmem:[#allocation8 + $0xa0] sm:$0xff]  ;;  %v81_v12 = vld [vmem:[#allocation8 + $0x98] sm:$0xff]  ;;  %v80_v13 = vld [vmem:[#allocation8 + $0x90] sm:$0xff] }
  0x2a   :  { %130 = vmatprep.subr.mxu0 %v89_v4  ;;  %314 = vmatprep.subr.mxu1 %v89_v4  ;;  %v79_v14 = vld [vmem:[#allocation8 + $0x88] sm:$0xff]  ;;  %v78_v15 = vld [vmem:[#allocation8 + $0x80] sm:$0xff]  ;;  %v77_v16 = vld [vmem:[#allocation8 + $0x78] sm:$0xff]  ;;  %p455_p4 = por %p454_p3, %p453_p2 }
  0x2b   :  { %131 = vmatpush1.msra.mxu0 %v88_v5  ;;  %346 = vmatpush1.msra.mxu1 %v88_v5  ;;  %v76_v17 = vld [vmem:[#allocation8 + $0x70] sm:$0xff]  ;;  %v75_v18 = vld [vmem:[#allocation8 + $0x68] sm:$0xff]  ;;  %v74_v19 = vld [vmem:[#allocation8 + $0x60] sm:$0xff] }
  0x2c   :  { %132 = vmatprep.subr.mxu0 %v87_v6  ;;  %315 = vmatprep.subr.mxu1 %v87_v6  ;;  %v73_v20 = vld [vmem:[#allocation8 + $0x58] sm:$0xff]  ;;  %v72_v21 = vld [vmem:[#allocation8 + $0x50] sm:$0xff]  ;;  %v71_v22 = vld [vmem:[#allocation8 + $0x48] sm:$0xff]  ;;  %p456_p5 = pnand %p455_p4, %p449_p1 }
  0x2d   :  { %133 = vmatpush1.msra.mxu0 %v86_v7  ;;  %347 = vmatpush1.msra.mxu1 %v86_v7  ;;  %v70_v23 = vld [vmem:[#allocation8 + $0x40] sm:$0xff]  ;;  %v69_v24 = vld [vmem:[#allocation8 + $0x38] sm:$0xff]  ;;  %v68_v25 = vld [vmem:[#allocation8 + $0x30] sm:$0xff] }
  0x2e   :  { %134 = vmatprep.subr.mxu0 %v85_v8  ;;  %316 = vmatprep.subr.mxu1 %v85_v8  ;;  %v67_v26 = vld [vmem:[#allocation8 + $0x28] sm:$0xff]  ;;  %v66_v27 = vld [vmem:[#allocation8 + $0x20] sm:$0xff]  ;;  %v65_v28 = vld [vmem:[#allocation8 + $0x18] sm:$0xff] }
  0x2f   :  { %135 = vmatpush1.msra.mxu0 %v84_v9  ;;  %348 = vmatpush1.msra.mxu1 %v84_v9  ;;  %v64_v29 = vld [vmem:[#allocation8 + $0x10] sm:$0xff]  ;;  %v63_v30 = vld [vmem:[#allocation8 + $0x8] sm:$0xff]  ;;  %v62_v31 = vld [vmem:[#allocation8] sm:$0xff] }
  0x30   :  { %136 = vmatprep.subr.mxu0 %v83_v10  ;;  %317 = vmatprep.subr.mxu1 %v83_v10  ;;  %v125_v32 = vld [vmem:[#allocation8 + $0x1f8] sm:$0xff]  ;;  %v124_v33 = vld [vmem:[#allocation8 + $0x1f0] sm:$0xff]  ;;  %v123_v34 = vld [vmem:[#allocation8 + $0x1e8] sm:$0xff] }
  0x31   :  { %137 = vmatpush1.msra.mxu0 %v82_v11  ;;  %349 = vmatpush1.msra.mxu1 %v82_v11  ;;  %v122_v35 = vld [vmem:[#allocation8 + $0x1e0] sm:$0xff]  ;;  %v121_v36 = vld [vmem:[#allocation8 + $0x1d8] sm:$0xff]  ;;  %v120_v37 = vld [vmem:[#allocation8 + $0x1d0] sm:$0xff] }
  0x32   :  { %138 = vmatprep.subr.mxu0 %v81_v12  ;;  %318 = vmatprep.subr.mxu1 %v81_v12  ;;  %v119_v38 = vld [vmem:[#allocation8 + $0x1c8] sm:$0xff]  ;;  %v118_v39 = vld [vmem:[#allocation8 + $0x1c0] sm:$0xff]  ;;  %v117_v40 = vld [vmem:[#allocation8 + $0x1b8] sm:$0xff] }
  0x33   :  { %139 = vmatpush1.msra.mxu0 %v80_v13  ;;  %350 = vmatpush1.msra.mxu1 %v80_v13  ;;  %v116_v41 = vld [vmem:[#allocation8 + $0x1b0] sm:$0xff]  ;;  %v115_v42 = vld [vmem:[#allocation8 + $0x1a8] sm:$0xff]  ;;  %v114_v43 = vld [vmem:[#allocation8 + $0x1a0] sm:$0xff] }
  0x34   :  { %140 = vmatprep.subr.mxu0 %v79_v14  ;;  %319 = vmatprep.subr.mxu1 %v79_v14  ;;  %v113_v44 = vld [vmem:[#allocation8 + $0x198] sm:$0xff]  ;;  %v112_v45 = vld [vmem:[#allocation8 + $0x190] sm:$0xff]  ;;  %v111_v46 = vld [vmem:[#allocation8 + $0x188] sm:$0xff] }
  0x35   :  { %141 = vmatpush1.msra.mxu0 %v78_v15  ;;  %351 = vmatpush1.msra.mxu1 %v78_v15  ;;  %v110_v47 = vld [vmem:[#allocation8 + $0x180] sm:$0xff]  ;;  %v109_v48 = vld [vmem:[#allocation8 + $0x178] sm:$0xff]  ;;  %v108_v49 = vld [vmem:[#allocation8 + $0x170] sm:$0xff] }
  0x36   :  { %142 = vmatprep.subr.mxu0 %v77_v16  ;;  %320 = vmatprep.subr.mxu1 %v77_v16  ;;  %v107_v50 = vld [vmem:[#allocation8 + $0x168] sm:$0xff]  ;;  %v106_v51 = vld [vmem:[#allocation8 + $0x160] sm:$0xff]  ;;  %v105_v52 = vld [vmem:[#allocation8 + $0x158] sm:$0xff] }
  0x37   :  { %143 = vmatpush1.msra.mxu0 %v76_v17  ;;  %352 = vmatpush1.msra.mxu1 %v76_v17  ;;  %v104_v53 = vld [vmem:[#allocation8 + $0x150] sm:$0xff]  ;;  %v103_v54 = vld [vmem:[#allocation8 + $0x148] sm:$0xff]  ;;  %v102_v55 = vld [vmem:[#allocation8 + $0x140] sm:$0xff] }
  0x38   :  { %144 = vmatprep.subr.mxu0 %v75_v18  ;;  %321 = vmatprep.subr.mxu1 %v75_v18  ;;  %v101_v56 = vld [vmem:[#allocation8 + $0x138] sm:$0xff]  ;;  %v100_v57 = vld [vmem:[#allocation8 + $0x130] sm:$0xff]  ;;  %v99_v58 = vld [vmem:[#allocation8 + $0x128] sm:$0xff] }
  0x39   :  { %145 = vmatpush1.msra.mxu0 %v74_v19  ;;  %353 = vmatpush1.msra.mxu1 %v74_v19  ;;  %v98_v59 = vld [vmem:[#allocation8 + $0x120] sm:$0xff]  ;;  %v97_v60 = vld [vmem:[#allocation8 + $0x118] sm:$0xff]  ;;  %v96_v61 = vld [vmem:[#allocation8 + $0x110] sm:$0xff] }
  0x3a   :  { %146 = vmatprep.subr.mxu0 %v73_v20  ;;  %322 = vmatprep.subr.mxu1 %v73_v20  ;;  %v53_v62 = vld [vmem:[#allocation3 + $0x8] sm:$0xff]  ;;  %v55_v0 = vld [vmem:[#allocation6 + $0x8] sm:$0xff]  ;;  %v52_v1 = vld [vmem:[#allocation3] sm:$0xff] }
  0x3b   :  { %147 = vmatpush1.msra.mxu0 %v72_v21  ;;  %354 = vmatpush1.msra.mxu1 %v72_v21  ;;  %v95_v63 = vld [vmem:[#allocation8 + $0x108] sm:$0xff]  ;;  %v94_v2 = vld [vmem:[#allocation8 + $0x100] sm:$0xff]  ;;  %v54_v3 = vld [vmem:[#allocation6] sm:$0xff]  ;;  %v59_v4 = vmul.f32 %v53_v62, %v53_v62  ;;  %v58_v5 = vmul.f32 %v52_v1, %v52_v1  ;;  %v61_v6 = vmul.f32 %v55_v0, %v53_v62 }
  0x3c   :  { %148 = vmatprep.subr.mxu0 %v71_v22  ;;  %323 = vmatprep.subr.mxu1 %v71_v22  ;;  %v57_v7 = vmul.f32 %v55_v0, %v55_v0  ;;  %v60_v8 = vmul.f32 %v54_v3, %v52_v1  ;;  %v56_v9 = vmul.f32 %v54_v3, %v54_v3 }
  0x3d   :  { %149 = vmatpush1.msra.mxu0 %v70_v23  ;;  %355 = vmatpush1.msra.mxu1 %v70_v23 }
  0x3e   :  { %150 = vmatprep.subr.mxu0 %v69_v24  ;;  %324 = vmatprep.subr.mxu1 %v69_v24 }
  0x3f   :  { %151 = vmatpush1.msra.mxu0 %v68_v25  ;;  %356 = vmatpush1.msra.mxu1 %v68_v25 }
  0x40   :  { %152 = vmatprep.subr.mxu0 %v67_v26  ;;  %325 = vmatprep.subr.mxu1 %v67_v26 }
  0x41   :  { %153 = vmatpush1.msra.mxu0 %v66_v27  ;;  %357 = vmatpush1.msra.mxu1 %v66_v27 }
  0x42   :  { %154 = vmatprep.subr.mxu0 %v65_v28  ;;  %326 = vmatprep.subr.mxu1 %v65_v28 }
  0x43   :  { %155 = vmatpush1.msra.mxu0 %v64_v29  ;;  %358 = vmatpush1.msra.mxu1 %v64_v29 }
  0x44   :  { %156 = vmatprep.subr.mxu0 %v63_v30  ;;  %327 = vmatprep.subr.mxu1 %v63_v30 }
  0x45   :  { %157 = vmatpush1.msra.mxu0 %v62_v31  ;;  %359 = vmatpush1.msra.mxu1 %v62_v31 }
  0x46   :  { %158 = vmatprep.subr.mxu0 %v125_v32  ;;  %328 = vmatprep.subr.mxu1 %v125_v32 }
  0x47   :  { %159 = vmatpush2.msra.mxu0 %v124_v33  ;;  %360 = vmatpush2.msra.mxu1 %v124_v33 }
  0x48   :  { %160 = vmatprep.subr.mxu0 %v123_v34  ;;  %329 = vmatprep.subr.mxu1 %v123_v34 }
  0x49   :  { %161 = vmatpush2.msra.mxu0 %v122_v35  ;;  %361 = vmatpush2.msra.mxu1 %v122_v35 }
  0x4a   :  { %162 = vmatprep.subr.mxu0 %v121_v36  ;;  %330 = vmatprep.subr.mxu1 %v121_v36 }
  0x4b   :  { %163 = vmatpush2.msra.mxu0 %v120_v37  ;;  %362 = vmatpush2.msra.mxu1 %v120_v37 }
  0x4c   :  { %164 = vmatprep.subr.mxu0 %v119_v38  ;;  %331 = vmatprep.subr.mxu1 %v119_v38 }
  0x4d   :  { %165 = vmatpush2.msra.mxu0 %v118_v39  ;;  %363 = vmatpush2.msra.mxu1 %v118_v39 }
  0x4e   :  { %166 = vmatprep.subr.mxu0 %v117_v40  ;;  %332 = vmatprep.subr.mxu1 %v117_v40 }
  0x4f   :  { %167 = vmatpush2.msra.mxu0 %v116_v41  ;;  %364 = vmatpush2.msra.mxu1 %v116_v41 }
  0x50   :  { %168 = vmatprep.subr.mxu0 %v115_v42  ;;  %333 = vmatprep.subr.mxu1 %v115_v42 }
  0x51   :  { %169 = vmatpush2.msra.mxu0 %v114_v43  ;;  %365 = vmatpush2.msra.mxu1 %v114_v43 }
  0x52   :  { %170 = vmatprep.subr.mxu0 %v113_v44  ;;  %334 = vmatprep.subr.mxu1 %v113_v44 }
  0x53   :  { %171 = vmatpush2.msra.mxu0 %v112_v45  ;;  %366 = vmatpush2.msra.mxu1 %v112_v45 }
  0x54   :  { %172 = vmatprep.subr.mxu0 %v111_v46  ;;  %335 = vmatprep.subr.mxu1 %v111_v46 }
  0x55   :  { %173 = vmatpush2.msra.mxu0 %v110_v47  ;;  %367 = vmatpush2.msra.mxu1 %v110_v47 }
  0x56   :  { %174 = vmatprep.subr.mxu0 %v109_v48  ;;  %336 = vmatprep.subr.mxu1 %v109_v48 }
  0x57   :  { %175 = vmatpush2.msra.mxu0 %v108_v49  ;;  %368 = vmatpush2.msra.mxu1 %v108_v49 }
  0x58   :  { %176 = vmatprep.subr.mxu0 %v107_v50  ;;  %337 = vmatprep.subr.mxu1 %v107_v50 }
  0x59   :  { %177 = vmatpush2.msra.mxu0 %v106_v51  ;;  %369 = vmatpush2.msra.mxu1 %v106_v51 }
  0x5a   :  { %178 = vmatprep.subr.mxu0 %v105_v52  ;;  %338 = vmatprep.subr.mxu1 %v105_v52 }
  0x5b   :  { %179 = vmatpush2.msra.mxu0 %v104_v53  ;;  %370 = vmatpush2.msra.mxu1 %v104_v53 }
  0x5c   :  { %180 = vmatprep.subr.mxu0 %v103_v54  ;;  %339 = vmatprep.subr.mxu1 %v103_v54 }
  0x5d   :  { %181 = vmatpush2.msra.mxu0 %v102_v55  ;;  %371 = vmatpush2.msra.mxu1 %v102_v55 }
  0x5e   :  { %182 = vmatprep.subr.mxu0 %v101_v56  ;;  %340 = vmatprep.subr.mxu1 %v101_v56 }
  0x5f   :  { %183 = vmatpush2.msra.mxu0 %v100_v57  ;;  %372 = vmatpush2.msra.mxu1 %v100_v57 }
  0x60   :  { %184 = vmatprep.subr.mxu0 %v99_v58  ;;  %341 = vmatprep.subr.mxu1 %v99_v58 }
  0x61   :  { %185 = vmatpush2.msra.mxu0 %v98_v59  ;;  %373 = vmatpush2.msra.mxu1 %v98_v59 }
  0x62   :  { %186 = vmatprep.subr.mxu0 %v97_v60  ;;  %342 = vmatprep.subr.mxu1 %v97_v60 }
  0x63   :  { %187 = vmatpush2.msra.mxu0 %v96_v61  ;;  %374 = vmatpush2.msra.mxu1 %v96_v61 }
  0x64   :  { %188 = vmatprep.subr.mxu0 %v95_v63  ;;  %190 = vmatprep.mubr.f32.mxu0 %v55_v0 }
  0x65   :  { %189 = vmatpush2.msra.mxu0 %v94_v2  ;;  %343 = vmatprep.subr.mxu1 %v95_v63 }
  0x66   :  { %191 = vmatmul.mubr.f32.vlgmr.msra.gmra.mxu0 %v54_v3  ;;  %375 = vmatpush2.msra.mxu1 %v94_v2 }
  0x67   :  { %208 = vmatprep.mubr.f32.mxu1 %v59_v4  ;;  %196 = vmatprep.mubr.f32.mxu0 %v53_v62 }
  0x68   :  { %209 = vmatmul.mubr.f32.vlgmr.msra.gmra.mxu1 %v58_v5 }
  0x69   :  { %214 = vmatprep.mubr.f32.mxu1 %v61_v6 }
  0x6a   :  { %197 = vmatmul.mubr.f32.gmra.mxu0 %v52_v1 }
  0x6b   :  { %202 = vmatprep.mubr.f32.mxu0 %v57_v7 }
  0x6c   :  { %215 = vmatmul.mubr.f32.gmra.mxu1 %v60_v8 }
  0x6e   :  { %203 = vmatmul.mubr.f32.gmra.mxu0 %v56_v9 }
 0x126   :  { %v192_v10 = vpop.f32.mrf.mxu0 }
 0x127   :  { %v241_v17 = vmul.f32 %v192_v10, %v192_v10 }
 0x128   :  { %v194_v11 = vpop.f32.mrf.mxu0  ;;  %v210_v13 = vpop.f32.mrf.mxu1 }
 0x129   :  { %v242_v19 = vmul.f32 %v194_v11, %v194_v11 }
 0x12a   :  { %v198_v12 = vpop.f32.mrf.mxu0  ;;  %v212_v22 = vpop.f32.mrf.mxu1 }
 0x12b   :  { %v243_v14 = vmul.f32 %v198_v12, %v198_v12  ;;  %v245_v37 = vmul.f32 %v198_v12, %v192_v10 }
 0x12c   :  { %v200_v15 = vpop.f32.mrf.mxu0  ;;  %v216_v36 = vpop.f32.mrf.mxu1 }
 0x12d   :  { %v244_v16 = vmul.f32 %v200_v15, %v200_v15  ;;  %v249_v20 = vsub.f32 %v210_v13, %v243_v14  ;;  %v263_v21 = vadd.f32 %v243_v14, %v241_v17  ;;  %v246_v38 = vmul.f32 %v200_v15, %v194_v11 }
 0x12e   :  { %v204_v18 = vpop.f32.mrf.mxu0  ;;  %v218_v39 = vpop.f32.mrf.mxu1  ;;  %v251_v40 = vsub.f32 %v216_v36, %v245_v37  ;;  %v253_v45 = vmul.f32 2.0, %v245_v37 }
 0x12f   :  { %v247_v23 = vsub.f32 %v204_v18, %v241_v17  ;;  %v250_v25 = vsub.f32 %v212_v22, %v244_v16  ;;  %v264_v26 = vadd.f32 %v244_v16, %v242_v19  ;;  %v265_v30 = vadd.f32 0.0001, %v263_v21 }
 0x130   :  { %v206_v24 = vpop.f32.mrf.mxu0  ;;  %v252_v41 = vsub.f32 %v218_v39, %v246_v38  ;;  %v257_v42 = vmul.f32 2.0, %v251_v40  ;;  %v254_v46 = vmul.f32 2.0, %v246_v38  ;;  %v255_v53 = vadd.f32 0.0001, %v253_v45 }
 0x131   :  { %v248_v27 = vsub.f32 %v206_v24, %v242_v19  ;;  %v267_v28 = vadd.f32 %v249_v20, %v247_v23  ;;  %v266_v32 = vadd.f32 0.0001, %v264_v26 }
 0x132   :  { %v258_v43 = vmul.f32 2.0, %v252_v41  ;;  %v259_v49 = vadd.f32 0.0009, %v257_v42  ;;  %v256_v54 = vadd.f32 0.0001, %v254_v46 }
 0x133   :  { %v268_v29 = vadd.f32 %v250_v25, %v248_v27  ;;  %v269_v31 = vadd.f32 0.0009, %v267_v28 }
 0x134   :  { %v260_v50 = vadd.f32 0.0009, %v258_v43  ;;  %v261_v57 = vmul.f32 %v259_v49, %v255_v53 }
 0x135   :  { %v270_v33 = vadd.f32 0.0009, %v268_v29  ;;  %v271_v34 = vmul.f32 %v269_v31, %v265_v30 }
 0x136   :  { %v262_v58 = vmul.f32 %v260_v50, %v256_v54 }
 0x137   :  { %v272_v35 = vmul.f32 %v270_v33, %v266_v32  ;;  %384 = vrcp.f32 %v271_v34 }
 0x139   :  { %386 = vrcp.f32 %v272_v35 }
 0x144   :  { %v385_v44 = vpop.eup %384 }
 0x145   :  { %v275_v48 = vmul.f32 %v385_v44, %v271_v34 }
 0x146   :  { %v387_v47 = vpop.eup %386 }
 0x147   :  { %v276_v51 = vmul.f32 %v387_v47, %v272_v35  ;;  %v277_v52 = vsub.f32 2.0, %v275_v48 }
 0x149   :  { %v278_v55 = vsub.f32 2.0, %v276_v51  ;;  %v279_v56 = vmul.f32 %v385_v44, %v277_v52 }
 0x14b   :  { %v280_v59 = vmul.f32 %v387_v47, %v278_v55  ;;  %v281_v60 = vmul.f32 %v279_v56, %v261_v57 }
 0x14d   :  { %v282_v61 = vmul.f32 %v280_v59, %v262_v58 }
 0x14f   :  { %v283_v62 = vadd.f32 %v282_v61, %v281_v60 }
 0x151   :  { %284 = vadd.xlane.f32.xlu0 %v283_v62 }
 0x1da   :  { %v285_v63 = vpop.xlane.xlu0 %284 }
 0x1db   :  { %v286_v0 = vrot.slane %v285_v63, 4 }
 0x1dd   :  { %v287_v1 = vadd.f32 %v286_v0, %v285_v63 }
 0x1df   :  { %v288_v2 = vrot.slane %v287_v1, 2 }
 0x1e1   :  { %v289_v3 = vadd.f32 %v288_v2, %v287_v1 }
 0x1e3   :  { %v290_v4 = vrot.slane %v289_v3, 1 }
 0x1e5   :  { %v291_v5 = vadd.f32 %v290_v4, %v289_v3 }
 0x1e7   :  { %376 = vpush %v291_v5 }
 0x218   :  { %s377_s28 = spop %376 }
 0x219   :  { %v294_v6 = vstv %s377_s28 }
 0x21a   :  { %295 = vst [vmem:[#allocation9] sm:$0xff] %v294_v6 }
 0x21b   :  { %459 = shalt.err (!%p456_p5)
}
 0x21c   :  { %305 = dma.vmem_to_hbm [thread:$0]  %s303_s2, 128, %s515_s3, [#allocation5]  }
 0x21d   :  { %472 = dma.done.wait [#allocation5], 128  }
 0x21e   :  { %473 = vsyncadd [#allocation5], 4294967168 }
 0x21f   :  { %309 = vsyncpa [#allocation4], 1 }
 0x220   :  { %310 = vsyncpa [#allocation7], 1 }
 0x221   :  { %311 = vsyncpa [#allocation5], 1 }

// kernel: tpu_custom_call.1
= control target key start
LH: loop header
LB: loop body
LE: loop exit
PB: predicated region body
PF: predicated region fallthrough
CT: control target
= control target key end

     0   :  { %8 = vsyncpa [#allocation4], 0  ;;  %s512_s0 = inlined_call_operand.hbm [shape: f32[8,256], index: 0, kind: input, shape index: {}]   ;;  %s513_s1 = inlined_call_operand.hbm [shape: f32[8,256], index: 1, kind: input, shape index: {}]   ;;  %s514_s2 = inlined_call_operand.hbm [shape: f32[256,256], index: 2, kind: input, shape index: {}]   ;;  %s515_s3 = inlined_call_operand.hbm [shape: f32[1,8,128], index: 3, kind: output, shape index: {}]  }
   0x1   :  { %9 = vsyncpa [#allocation7], 0 }
   0x2   :  { %10 = vsyncpa [#allocation5], 0  ;;  %s474_s12 = smov [#allocation6]   ;;  %s475_s14 = smov [#allocation3]  }
   0x3   :  { %s27_s13 = sshll.u32 %s474_s12, 4  ;;  %s17_s15 = sshll.u32 %s475_s14, 4  ;;  %s28_s13 = int_to_ptr.vmem [resolvable:$true] %s27_s13  ;;  %s18_s15 = int_to_ptr.vmem [resolvable:$true] %s17_s15 }
   0x4   :  { %s396_s16 = scalar_lea.vmem %s28_s13, 256  ;;  %p401_p1 = scmp.lt.s32.totalorder %s28_s13, %s28_s13 }
   0x5   :  { %p397_p0 = scmp.ne.s32.totalorder %s28_s13, %s396_s16  ;;  %p402_p2 = scmp.lt.s32.totalorder %s396_s16, %s396_s16 }
   0x7   :  { %p403_p3 = por %p402_p2, %p401_p1 }
   0x9   :  { %p404_p4 = pnand %p403_p3, %p397_p0 }
   0xb   :  { %407 = shalt.err (!%p404_p4)
}
   0xc   :  { %30 = dma.hbm_to_vmem [thread:$0]  %s513_s1, 256, %s28_s13, [#allocation7]  }
   0xd   :  { %s416_s19 = scalar_lea.vmem %s18_s15, 256  ;;  %p421_p6 = scmp.lt.s32.totalorder %s18_s15, %s18_s15 }
   0xe   :  { %p417_p5 = scmp.ne.s32.totalorder %s18_s15, %s416_s19  ;;  %p422_p7 = scmp.lt.s32.totalorder %s416_s19, %s416_s19 }
  0x10   :  { %p423_p8 = por %p422_p7, %p421_p6 }
  0x12   :  { %p424_p9 = pnand %p423_p8, %p417_p5 }
  0x14   :  { %427 = shalt.err (!%p424_p9)
}
  0x15   :  { %20 = dma.hbm_to_vmem [thread:$0]  %s512_s0, 256, %s18_s15, [#allocation4]  }
  0x16   :  { %s476_s22 = smov [#allocation8]  }
  0x17   :  { %s36_s23 = sshll.u32 %s476_s22, 4  ;;  %s37_s23 = int_to_ptr.vmem [resolvable:$true] %s36_s23 }
  0x18   :  { %s436_s24 = scalar_lea.vmem %s37_s23, 8192  ;;  %p441_p11 = scmp.lt.s32.totalorder %s37_s23, %s37_s23 }
  0x19   :  { %p437_p10 = scmp.ne.s32.totalorder %s37_s23, %s436_s24  ;;  %p442_p12 = scmp.lt.s32.totalorder %s436_s24, %s436_s24 }
  0x1b   :  { %p443_p13 = por %p442_p12, %p441_p11 }
  0x1d   :  { %p444_p0 = pnand %p443_p13, %p437_p10 }
  0x1f   :  { %447 = shalt.err (!%p444_p0)
}
  0x20   :  { %s477_s1 = smov 256   ;;  %s478_s25 = smov 16  }
  0x21   :  { %42 = dma.hbm_to_vmem [thread:$0]  %s514_s2, 8192, %s37_s23, [#allocation7], %s477_s1, %s477_s1, %s478_s25  }
  0x22   :  { %468 = dma.done.wait [#allocation4], 256  }
  0x23   :  { %469 = vsyncadd [#allocation4], 4294967040 }
  0x24   :  { %470 = dma.done.wait [#allocation7], 8448  }
  0x25   :  { %471 = vsyncadd [#allocation7], 4294958848  ;;  %v93_v0 = vld [vmem:[#allocation8 + $0xf8] sm:$0xff]  ;;  %v92_v1 = vld [vmem:[#allocation8 + $0xf0] sm:$0xff]  ;;  %s479_s0 = smov [#allocation9]  }
  0x26   :  { %v91_v2 = vld [vmem:[#allocation8 + $0xe8] sm:$0xff]  ;;  %126 = vmatprep.subr.mxu0 %v93_v0  ;;  %312 = vmatprep.subr.mxu1 %v93_v0  ;;  %v90_v3 = vld [vmem:[#allocation8 + $0xe0] sm:$0xff]  ;;  %v89_v4 = vld [vmem:[#allocation8 + $0xd8] sm:$0xff]  ;;  %s302_s2 = sshll.u32 %s479_s0, 4  ;;  %s303_s2 = int_to_ptr.vmem [resolvable:$true] %s302_s2 }
  0x27   :  { %127 = vmatpush1.msra.mxu0 %v92_v1  ;;  %344 = vmatpush1.msra.mxu1 %v92_v1  ;;  %v88_v5 = vld [vmem:[#allocation8 + $0xd0] sm:$0xff]  ;;  %v87_v6 = vld [vmem:[#allocation8 + $0xc8] sm:$0xff]  ;;  %v86_v7 = vld [vmem:[#allocation8 + $0xc0] sm:$0xff]  ;;  %s448_s29 = scalar_lea.vmem %s303_s2, 128  ;;  %p453_p2 = scmp.lt.s32.totalorder %s303_s2, %s303_s2 }
  0x28   :  { %128 = vmatprep.subr.mxu0 %v91_v2  ;;  %313 = vmatprep.subr.mxu1 %v91_v2  ;;  %v85_v8 = vld [vmem:[#allocation8 + $0xb8] sm:$0xff]  ;;  %v84_v9 = vld [vmem:[#allocation8 + $0xb0] sm:$0xff]  ;;  %v83_v10 = vld [vmem:[#allocation8 + $0xa8] sm:$0xff]  ;;  %p449_p1 = scmp.ne.s32.totalorder %s303_s2, %s448_s29  ;;  %p454_p3 = scmp.lt.s32.totalorder %s448_s29, %s448_s29 }
  0x29   :  { %129 = vmatpush1.msra.mxu0 %v90_v3  ;;  %345 = vmatpush1.msra.mxu1 %v90_v3  ;;  %v82_v11 = vld [vmem:[#allocation8 + $0xa0] sm:$0xff]  ;;  %v81_v12 = vld [vmem:[#allocation8 + $0x98] sm:$0xff]  ;;  %v80_v13 = vld [vmem:[#allocation8 + $0x90] sm:$0xff] }
  0x2a   :  { %130 = vmatprep.subr.mxu0 %v89_v4  ;;  %314 = vmatprep.subr.mxu1 %v89_v4  ;;  %v79_v14 = vld [vmem:[#allocation8 + $0x88] sm:$0xff]  ;;  %v78_v15 = vld [vmem:[#allocation8 + $0x80] sm:$0xff]  ;;  %v77_v16 = vld [vmem:[#allocation8 + $0x78] sm:$0xff]  ;;  %p455_p4 = por %p454_p3, %p453_p2 }
  0x2b   :  { %131 = vmatpush1.msra.mxu0 %v88_v5  ;;  %346 = vmatpush1.msra.mxu1 %v88_v5  ;;  %v76_v17 = vld [vmem:[#allocation8 + $0x70] sm:$0xff]  ;;  %v75_v18 = vld [vmem:[#allocation8 + $0x68] sm:$0xff]  ;;  %v74_v19 = vld [vmem:[#allocation8 + $0x60] sm:$0xff] }
  0x2c   :  { %132 = vmatprep.subr.mxu0 %v87_v6  ;;  %315 = vmatprep.subr.mxu1 %v87_v6  ;;  %v73_v20 = vld [vmem:[#allocation8 + $0x58] sm:$0xff]  ;;  %v72_v21 = vld [vmem:[#allocation8 + $0x50] sm:$0xff]  ;;  %v71_v22 = vld [vmem:[#allocation8 + $0x48] sm:$0xff]  ;;  %p456_p5 = pnand %p455_p4, %p449_p1 }
  0x2d   :  { %133 = vmatpush1.msra.mxu0 %v86_v7  ;;  %347 = vmatpush1.msra.mxu1 %v86_v7  ;;  %v70_v23 = vld [vmem:[#allocation8 + $0x40] sm:$0xff]  ;;  %v69_v24 = vld [vmem:[#allocation8 + $0x38] sm:$0xff]  ;;  %v68_v25 = vld [vmem:[#allocation8 + $0x30] sm:$0xff] }
  0x2e   :  { %134 = vmatprep.subr.mxu0 %v85_v8  ;;  %316 = vmatprep.subr.mxu1 %v85_v8  ;;  %v67_v26 = vld [vmem:[#allocation8 + $0x28] sm:$0xff]  ;;  %v66_v27 = vld [vmem:[#allocation8 + $0x20] sm:$0xff]  ;;  %v65_v28 = vld [vmem:[#allocation8 + $0x18] sm:$0xff] }
  0x2f   :  { %135 = vmatpush1.msra.mxu0 %v84_v9  ;;  %348 = vmatpush1.msra.mxu1 %v84_v9  ;;  %v64_v29 = vld [vmem:[#allocation8 + $0x10] sm:$0xff]  ;;  %v63_v30 = vld [vmem:[#allocation8 + $0x8] sm:$0xff]  ;;  %v62_v31 = vld [vmem:[#allocation8] sm:$0xff] }
  0x30   :  { %136 = vmatprep.subr.mxu0 %v83_v10  ;;  %317 = vmatprep.subr.mxu1 %v83_v10  ;;  %v125_v32 = vld [vmem:[#allocation8 + $0x1f8] sm:$0xff]  ;;  %v124_v33 = vld [vmem:[#allocation8 + $0x1f0] sm:$0xff]  ;;  %v123_v34 = vld [vmem:[#allocation8 + $0x1e8] sm:$0xff] }
  0x31   :  { %137 = vmatpush1.msra.mxu0 %v82_v11  ;;  %349 = vmatpush1.msra.mxu1 %v82_v11  ;;  %v122_v35 = vld [vmem:[#allocation8 + $0x1e0] sm:$0xff]  ;;  %v121_v36 = vld [vmem:[#allocation8 + $0x1d8] sm:$0xff]  ;;  %v120_v37 = vld [vmem:[#allocation8 + $0x1d0] sm:$0xff] }
  0x32   :  { %138 = vmatprep.subr.mxu0 %v81_v12  ;;  %318 = vmatprep.subr.mxu1 %v81_v12  ;;  %v119_v38 = vld [vmem:[#allocation8 + $0x1c8] sm:$0xff]  ;;  %v118_v39 = vld [vmem:[#allocation8 + $0x1c0] sm:$0xff]  ;;  %v117_v40 = vld [vmem:[#allocation8 + $0x1b8] sm:$0xff] }
  0x33   :  { %139 = vmatpush1.msra.mxu0 %v80_v13  ;;  %350 = vmatpush1.msra.mxu1 %v80_v13  ;;  %v116_v41 = vld [vmem:[#allocation8 + $0x1b0] sm:$0xff]  ;;  %v115_v42 = vld [vmem:[#allocation8 + $0x1a8] sm:$0xff]  ;;  %v114_v43 = vld [vmem:[#allocation8 + $0x1a0] sm:$0xff] }
  0x34   :  { %140 = vmatprep.subr.mxu0 %v79_v14  ;;  %319 = vmatprep.subr.mxu1 %v79_v14  ;;  %v113_v44 = vld [vmem:[#allocation8 + $0x198] sm:$0xff]  ;;  %v112_v45 = vld [vmem:[#allocation8 + $0x190] sm:$0xff]  ;;  %v111_v46 = vld [vmem:[#allocation8 + $0x188] sm:$0xff] }
  0x35   :  { %141 = vmatpush1.msra.mxu0 %v78_v15  ;;  %351 = vmatpush1.msra.mxu1 %v78_v15  ;;  %v110_v47 = vld [vmem:[#allocation8 + $0x180] sm:$0xff]  ;;  %v109_v48 = vld [vmem:[#allocation8 + $0x178] sm:$0xff]  ;;  %v108_v49 = vld [vmem:[#allocation8 + $0x170] sm:$0xff] }
  0x36   :  { %142 = vmatprep.subr.mxu0 %v77_v16  ;;  %320 = vmatprep.subr.mxu1 %v77_v16  ;;  %v107_v50 = vld [vmem:[#allocation8 + $0x168] sm:$0xff]  ;;  %v106_v51 = vld [vmem:[#allocation8 + $0x160] sm:$0xff]  ;;  %v105_v52 = vld [vmem:[#allocation8 + $0x158] sm:$0xff] }
  0x37   :  { %143 = vmatpush1.msra.mxu0 %v76_v17  ;;  %352 = vmatpush1.msra.mxu1 %v76_v17  ;;  %v104_v53 = vld [vmem:[#allocation8 + $0x150] sm:$0xff]  ;;  %v103_v54 = vld [vmem:[#allocation8 + $0x148] sm:$0xff]  ;;  %v102_v55 = vld [vmem:[#allocation8 + $0x140] sm:$0xff] }
  0x38   :  { %144 = vmatprep.subr.mxu0 %v75_v18  ;;  %321 = vmatprep.subr.mxu1 %v75_v18  ;;  %v101_v56 = vld [vmem:[#allocation8 + $0x138] sm:$0xff]  ;;  %v100_v57 = vld [vmem:[#allocation8 + $0x130] sm:$0xff]  ;;  %v99_v58 = vld [vmem:[#allocation8 + $0x128] sm:$0xff] }
  0x39   :  { %145 = vmatpush1.msra.mxu0 %v74_v19  ;;  %353 = vmatpush1.msra.mxu1 %v74_v19  ;;  %v98_v59 = vld [vmem:[#allocation8 + $0x120] sm:$0xff]  ;;  %v97_v60 = vld [vmem:[#allocation8 + $0x118] sm:$0xff]  ;;  %v96_v61 = vld [vmem:[#allocation8 + $0x110] sm:$0xff] }
  0x3a   :  { %146 = vmatprep.subr.mxu0 %v73_v20  ;;  %322 = vmatprep.subr.mxu1 %v73_v20  ;;  %v53_v62 = vld [vmem:[#allocation3 + $0x8] sm:$0xff]  ;;  %v55_v0 = vld [vmem:[#allocation6 + $0x8] sm:$0xff]  ;;  %v52_v1 = vld [vmem:[#allocation3] sm:$0xff] }
  0x3b   :  { %147 = vmatpush1.msra.mxu0 %v72_v21  ;;  %354 = vmatpush1.msra.mxu1 %v72_v21  ;;  %v95_v63 = vld [vmem:[#allocation8 + $0x108] sm:$0xff]  ;;  %v94_v2 = vld [vmem:[#allocation8 + $0x100] sm:$0xff]  ;;  %v54_v3 = vld [vmem:[#allocation6] sm:$0xff]  ;;  %v59_v4 = vmul.f32 %v53_v62, %v53_v62  ;;  %v58_v5 = vmul.f32 %v52_v1, %v52_v1  ;;  %v61_v6 = vmul.f32 %v55_v0, %v53_v62 }
  0x3c   :  { %148 = vmatprep.subr.mxu0 %v71_v22  ;;  %323 = vmatprep.subr.mxu1 %v71_v22  ;;  %v57_v7 = vmul.f32 %v55_v0, %v55_v0  ;;  %v60_v8 = vmul.f32 %v54_v3, %v52_v1  ;;  %v56_v9 = vmul.f32 %v54_v3, %v54_v3 }
  0x3d   :  { %149 = vmatpush1.msra.mxu0 %v70_v23  ;;  %355 = vmatpush1.msra.mxu1 %v70_v23 }
  0x3e   :  { %150 = vmatprep.subr.mxu0 %v69_v24  ;;  %324 = vmatprep.subr.mxu1 %v69_v24 }
  0x3f   :  { %151 = vmatpush1.msra.mxu0 %v68_v25  ;;  %356 = vmatpush1.msra.mxu1 %v68_v25 }
  0x40   :  { %152 = vmatprep.subr.mxu0 %v67_v26  ;;  %325 = vmatprep.subr.mxu1 %v67_v26 }
  0x41   :  { %153 = vmatpush1.msra.mxu0 %v66_v27  ;;  %357 = vmatpush1.msra.mxu1 %v66_v27 }
  0x42   :  { %154 = vmatprep.subr.mxu0 %v65_v28  ;;  %326 = vmatprep.subr.mxu1 %v65_v28 }
  0x43   :  { %155 = vmatpush1.msra.mxu0 %v64_v29  ;;  %358 = vmatpush1.msra.mxu1 %v64_v29 }
  0x44   :  { %156 = vmatprep.subr.mxu0 %v63_v30  ;;  %327 = vmatprep.subr.mxu1 %v63_v30 }
  0x45   :  { %157 = vmatpush1.msra.mxu0 %v62_v31  ;;  %359 = vmatpush1.msra.mxu1 %v62_v31 }
  0x46   :  { %158 = vmatprep.subr.mxu0 %v125_v32  ;;  %328 = vmatprep.subr.mxu1 %v125_v32 }
  0x47   :  { %159 = vmatpush2.msra.mxu0 %v124_v33  ;;  %360 = vmatpush2.msra.mxu1 %v124_v33 }
  0x48   :  { %160 = vmatprep.subr.mxu0 %v123_v34  ;;  %329 = vmatprep.subr.mxu1 %v123_v34 }
  0x49   :  { %161 = vmatpush2.msra.mxu0 %v122_v35  ;;  %361 = vmatpush2.msra.mxu1 %v122_v35 }
  0x4a   :  { %162 = vmatprep.subr.mxu0 %v121_v36  ;;  %330 = vmatprep.subr.mxu1 %v121_v36 }
  0x4b   :  { %163 = vmatpush2.msra.mxu0 %v120_v37  ;;  %362 = vmatpush2.msra.mxu1 %v120_v37 }
  0x4c   :  { %164 = vmatprep.subr.mxu0 %v119_v38  ;;  %331 = vmatprep.subr.mxu1 %v119_v38 }
  0x4d   :  { %165 = vmatpush2.msra.mxu0 %v118_v39  ;;  %363 = vmatpush2.msra.mxu1 %v118_v39 }
  0x4e   :  { %166 = vmatprep.subr.mxu0 %v117_v40  ;;  %332 = vmatprep.subr.mxu1 %v117_v40 }
  0x4f   :  { %167 = vmatpush2.msra.mxu0 %v116_v41  ;;  %364 = vmatpush2.msra.mxu1 %v116_v41 }
  0x50   :  { %168 = vmatprep.subr.mxu0 %v115_v42  ;;  %333 = vmatprep.subr.mxu1 %v115_v42 }
  0x51   :  { %169 = vmatpush2.msra.mxu0 %v114_v43  ;;  %365 = vmatpush2.msra.mxu1 %v114_v43 }
  0x52   :  { %170 = vmatprep.subr.mxu0 %v113_v44  ;;  %334 = vmatprep.subr.mxu1 %v113_v44 }
  0x53   :  { %171 = vmatpush2.msra.mxu0 %v112_v45  ;;  %366 = vmatpush2.msra.mxu1 %v112_v45 }
  0x54   :  { %172 = vmatprep.subr.mxu0 %v111_v46  ;;  %335 = vmatprep.subr.mxu1 %v111_v46 }
  0x55   :  { %173 = vmatpush2.msra.mxu0 %v110_v47  ;;  %367 = vmatpush2.msra.mxu1 %v110_v47 }
  0x56   :  { %174 = vmatprep.subr.mxu0 %v109_v48  ;;  %336 = vmatprep.subr.mxu1 %v109_v48 }
  0x57   :  { %175 = vmatpush2.msra.mxu0 %v108_v49  ;;  %368 = vmatpush2.msra.mxu1 %v108_v49 }
  0x58   :  { %176 = vmatprep.subr.mxu0 %v107_v50  ;;  %337 = vmatprep.subr.mxu1 %v107_v50 }
  0x59   :  { %177 = vmatpush2.msra.mxu0 %v106_v51  ;;  %369 = vmatpush2.msra.mxu1 %v106_v51 }
  0x5a   :  { %178 = vmatprep.subr.mxu0 %v105_v52  ;;  %338 = vmatprep.subr.mxu1 %v105_v52 }
  0x5b   :  { %179 = vmatpush2.msra.mxu0 %v104_v53  ;;  %370 = vmatpush2.msra.mxu1 %v104_v53 }
  0x5c   :  { %180 = vmatprep.subr.mxu0 %v103_v54  ;;  %339 = vmatprep.subr.mxu1 %v103_v54 }
  0x5d   :  { %181 = vmatpush2.msra.mxu0 %v102_v55  ;;  %371 = vmatpush2.msra.mxu1 %v102_v55 }
  0x5e   :  { %182 = vmatprep.subr.mxu0 %v101_v56  ;;  %340 = vmatprep.subr.mxu1 %v101_v56 }
  0x5f   :  { %183 = vmatpush2.msra.mxu0 %v100_v57  ;;  %372 = vmatpush2.msra.mxu1 %v100_v57 }
  0x60   :  { %184 = vmatprep.subr.mxu0 %v99_v58  ;;  %341 = vmatprep.subr.mxu1 %v99_v58 }
  0x61   :  { %185 = vmatpush2.msra.mxu0 %v98_v59  ;;  %373 = vmatpush2.msra.mxu1 %v98_v59 }
  0x62   :  { %186 = vmatprep.subr.mxu0 %v97_v60  ;;  %342 = vmatprep.subr.mxu1 %v97_v60 }
  0x63   :  { %187 = vmatpush2.msra.mxu0 %v96_v61  ;;  %374 = vmatpush2.msra.mxu1 %v96_v61 }
  0x64   :  { %188 = vmatprep.subr.mxu0 %v95_v63  ;;  %190 = vmatprep.mubr.f32.mxu0 %v55_v0 }
  0x65   :  { %189 = vmatpush2.msra.mxu0 %v94_v2  ;;  %343 = vmatprep.subr.mxu1 %v95_v63 }
  0x66   :  { %191 = vmatmul.mubr.f32.vlgmr.msra.gmra.mxu0 %v54_v3  ;;  %375 = vmatpush2.msra.mxu1 %v94_v2 }
  0x67   :  { %208 = vmatprep.mubr.f32.mxu1 %v59_v4  ;;  %196 = vmatprep.mubr.f32.mxu0 %v53_v62 }
  0x68   :  { %209 = vmatmul.mubr.f32.vlgmr.msra.gmra.mxu1 %v58_v5 }
  0x69   :  { %214 = vmatprep.mubr.f32.mxu1 %v61_v6 }
  0x6a   :  { %197 = vmatmul.mubr.f32.gmra.mxu0 %v52_v1 }
  0x6b   :  { %202 = vmatprep.mubr.f32.mxu0 %v57_v7 }
  0x6c   :  { %215 = vmatmul.mubr.f32.gmra.mxu1 %v60_v8 }
  0x6e   :  { %203 = vmatmul.mubr.f32.gmra.mxu0 %v56_v9 }
 0x126   :  { %v192_v10 = vpop.f32.mrf.mxu0 }
 0x127   :  { %v241_v17 = vmul.f32 %v192_v10, %v192_v10 }
 0x128   :  { %v194_v11 = vpop.f32.mrf.mxu0  ;;  %v210_v13 = vpop.f32.mrf.mxu1 }
 0x129   :  { %v242_v19 = vmul.f32 %v194_v11, %v194_v11 }
 0x12a   :  { %v198_v12 = vpop.f32.mrf.mxu0  ;;  %v212_v22 = vpop.f32.mrf.mxu1 }
 0x12b   :  { %v243_v14 = vmul.f32 %v198_v12, %v198_v12  ;;  %v245_v37 = vmul.f32 %v198_v12, %v192_v10 }
 0x12c   :  { %v200_v15 = vpop.f32.mrf.mxu0  ;;  %v216_v36 = vpop.f32.mrf.mxu1 }
 0x12d   :  { %v244_v16 = vmul.f32 %v200_v15, %v200_v15  ;;  %v249_v20 = vsub.f32 %v210_v13, %v243_v14  ;;  %v263_v21 = vadd.f32 %v243_v14, %v241_v17  ;;  %v246_v38 = vmul.f32 %v200_v15, %v194_v11 }
 0x12e   :  { %v204_v18 = vpop.f32.mrf.mxu0  ;;  %v218_v39 = vpop.f32.mrf.mxu1  ;;  %v251_v40 = vsub.f32 %v216_v36, %v245_v37  ;;  %v253_v45 = vmul.f32 2.0, %v245_v37 }
 0x12f   :  { %v247_v23 = vsub.f32 %v204_v18, %v241_v17  ;;  %v250_v25 = vsub.f32 %v212_v22, %v244_v16  ;;  %v264_v26 = vadd.f32 %v244_v16, %v242_v19  ;;  %v265_v30 = vadd.f32 0.0001, %v263_v21 }
 0x130   :  { %v206_v24 = vpop.f32.mrf.mxu0  ;;  %v252_v41 = vsub.f32 %v218_v39, %v246_v38  ;;  %v257_v42 = vmul.f32 2.0, %v251_v40  ;;  %v254_v46 = vmul.f32 2.0, %v246_v38  ;;  %v255_v53 = vadd.f32 0.0001, %v253_v45 }
 0x131   :  { %v248_v27 = vsub.f32 %v206_v24, %v242_v19  ;;  %v267_v28 = vadd.f32 %v249_v20, %v247_v23  ;;  %v266_v32 = vadd.f32 0.0001, %v264_v26 }
 0x132   :  { %v258_v43 = vmul.f32 2.0, %v252_v41  ;;  %v259_v49 = vadd.f32 0.0009, %v257_v42  ;;  %v256_v54 = vadd.f32 0.0001, %v254_v46 }
 0x133   :  { %v268_v29 = vadd.f32 %v250_v25, %v248_v27  ;;  %v269_v31 = vadd.f32 0.0009, %v267_v28 }
 0x134   :  { %v260_v50 = vadd.f32 0.0009, %v258_v43  ;;  %v261_v57 = vmul.f32 %v259_v49, %v255_v53 }
 0x135   :  { %v270_v33 = vadd.f32 0.0009, %v268_v29  ;;  %v271_v34 = vmul.f32 %v269_v31, %v265_v30 }
 0x136   :  { %v262_v58 = vmul.f32 %v260_v50, %v256_v54 }
 0x137   :  { %v272_v35 = vmul.f32 %v270_v33, %v266_v32  ;;  %384 = vrcp.f32 %v271_v34 }
 0x139   :  { %386 = vrcp.f32 %v272_v35 }
 0x144   :  { %v385_v44 = vpop.eup %384 }
 0x145   :  { %v275_v48 = vmul.f32 %v385_v44, %v271_v34 }
 0x146   :  { %v387_v47 = vpop.eup %386 }
 0x147   :  { %v276_v51 = vmul.f32 %v387_v47, %v272_v35  ;;  %v277_v52 = vsub.f32 2.0, %v275_v48 }
 0x149   :  { %v278_v55 = vsub.f32 2.0, %v276_v51  ;;  %v279_v56 = vmul.f32 %v385_v44, %v277_v52 }
 0x14b   :  { %v280_v59 = vmul.f32 %v387_v47, %v278_v55  ;;  %v281_v60 = vmul.f32 %v279_v56, %v261_v57 }
 0x14d   :  { %v282_v61 = vmul.f32 %v280_v59, %v262_v58 }
 0x14f   :  { %v283_v62 = vadd.f32 %v282_v61, %v281_v60 }
 0x151   :  { %284 = vadd.xlane.f32.xlu0 %v283_v62 }
 0x1da   :  { %v285_v63 = vpop.xlane.xlu0 %284 }
 0x1db   :  { %v286_v0 = vrot.slane %v285_v63, 4 }
 0x1dd   :  { %v287_v1 = vadd.f32 %v286_v0, %v285_v63 }
 0x1df   :  { %v288_v2 = vrot.slane %v287_v1, 2 }
 0x1e1   :  { %v289_v3 = vadd.f32 %v288_v2, %v287_v1 }
 0x1e3   :  { %v290_v4 = vrot.slane %v289_v3, 1 }
 0x1e5   :  { %v291_v5 = vadd.f32 %v290_v4, %v289_v3 }
 0x1e7   :  { %376 = vpush %v291_v5 }
 0x218   :  { %s377_s28 = spop %376 }
 0x219   :  { %v294_v6 = vstv %s377_s28 }
 0x21a   :  { %295 = vst [vmem:[#allocation9] sm:$0xff] %v294_v6 }
 0x21b   :  { %459 = shalt.err (!%p456_p5)
}
 0x21c   :  { %305 = dma.vmem_to_hbm [thread:$0]  %s303_s2, 128, %s515_s3, [#allocation5]  }
 0x21d   :  { %472 = dma.done.wait [#allocation5], 128  }
 0x21e   :  { %473 = vsyncadd [#allocation5], 4294967168 }
 0x21f   :  { %309 = vsyncpa [#allocation4], 1 }
 0x220   :  { %310 = vsyncpa [#allocation7], 1 }
 0x221   :  { %311 = vsyncpa [#allocation5], 1 }

</bundles_post_ra>
